<compile_context>
chip_gen: v6e
topology: v6e:2x2x1
jax: 0.10.0
libtpu: 0.0.40
codegen_flags: <defaults>
</compile_context>

<pallas_src>
import functools

import jax
import jax.numpy as jnp
from jax import lax
from jax.experimental import pallas as pl
from jax.experimental.pallas import tpu as pltpu

_LANE = 128
_SUB = 8


def _round_up(a, b):
    return -(-a // b) * b


def _dice_loss_kernel(x_ref, t_ref, o_ref, acc_ref, *, s_total, tile_s, ragged):
    s = pl.program_id(1)

    @pl.when(s == 0)
    def _():
        acc_ref[0] = 0.0  # running intersection: sum_c softmax(x)_c * t_c
        acc_ref[1] = 0.0  # running sum(targets)

    x = x_ref[...].astype(jnp.float32)  # (BN, C, TILE_S)
    t = t_ref[...].astype(jnp.float32)  # (BN, C, TILE_S)

    # Numerically stable softmax over channels without materializing p:
    #   sum_c softmax(x)_c * t_c == (sum_c e_c * t_c) * (1 / sum_c e_c)
    m = jnp.max(x, axis=1, keepdims=True)          # (BN, 1, TILE_S)
    e = jnp.exp(x - m)                             # EUP
    r = jnp.sum(e, axis=1, keepdims=True)          # softmax denominator
    s_et = jnp.sum(e * t, axis=1, keepdims=True)   # sum_c e_c * t_c
    contrib = s_et * pl.reciprocal(r, approx=True)  # EUP reciprocal (slack slot)

    if ragged:
        # Last spatial tile is partial: out-of-bounds lanes hold undefined data.
        # Zero both contributions there (select also kills any NaN/Inf garbage).
        col = lax.broadcasted_iota(jnp.int32, (1, 1, tile_s), 2)
        valid = (col + s * tile_s) < s_total
        contrib = jnp.where(valid, contrib, 0.0)
        t = jnp.where(valid, t, 0.0)

    acc_ref[0] += jnp.sum(contrib)
    acc_ref[1] += jnp.sum(t)

    @pl.when(s == pl.num_programs(1) - 1)
    def _():
        # Lane-dense per-batch-block partials; the wrapper reads [:, :, 0, 0].
        o_ref[0, 0] = jnp.full((_SUB, _LANE), acc_ref[0], jnp.float32)
        o_ref[0, 1] = jnp.full((_SUB, _LANE), acc_ref[1], jnp.float32)


def dice_loss(inputs, targets, smooth=1, *, block_budget_bytes=None):
    assert inputs.shape == targets.shape
    N, C = int(inputs.shape[0]), int(inputs.shape[1])
    S = 1
    for d in inputs.shape[2:]:
        S *= int(d)

    # Free (metadata-only) reshape: the spatial axis becomes the lane axis.
    x = inputs.reshape(N, C, S)
    t = targets.reshape(N, C, S)

    x_item = jnp.dtype(x.dtype).itemsize
    t_item = jnp.dtype(t.dtype).itemsize

    # Generation-aware VMEM budget (v5e/v6e: 128 MiB physical, v7x: 64 MiB).
    try:
        vmem_cap = int(pltpu.get_tpu_info().vmem_capacity_bytes)
    except Exception:  # be conservative: assume the smallest (v7x-sized) VMEM
        vmem_cap = 64 << 20
    budget = min(vmem_cap // 2, 48 << 20)
    if block_budget_bytes is not None:
        budget = int(block_budget_bytes)

    # Bytes per block element: 2 pipeline buffers x (x + t) input bytes plus
    # ~4x f32 in-kernel temporaries (x_f32 / t_f32 / e / e*t).
    per_elem = 2 * (x_item + t_item) + 16
    max_block_elems = max(budget // per_elem, C * _LANE)

    # Spatial tile: multiple of 128 lanes (or covers all of S), capped by the
    # VMEM byte budget.  Large (>= 1 MiB) blocks keep us near the HBM roofline.
    s_aligned = _round_up(S, _LANE)
    max_cols = max(((max_block_elems // C) // _LANE) * _LANE, _LANE)
    tile_s = min(s_aligned, max_cols)
    grid_s = -(-S // tile_s)
    ragged = (S % tile_s) != 0

    # Batch blocking: when the whole spatial extent fits one tile, pack several
    # batch rows per block (BN | N) so small images still get large DMAs.
    bn = 1
    if grid_s == 1:
        per_n = C * tile_s
        for d in range(1, N + 1):
            if N % d == 0 and d * per_n <= max_block_elems:
                bn = d
    grid_n = N // bn

    kernel = functools.partial(
        _dice_loss_kernel, s_total=S, tile_s=tile_s, ragged=ragged
    )

    # Raise the scoped-VMEM limit past the 16/32 MiB defaults so the larger
    # blocks (and their double buffers + f32 temporaries) are accepted, while
    # staying under physical VMEM on every generation.
    vmem_limit = max(min(vmem_cap, int(budget * 1.5) + (8 << 20)), 16 << 20)

    cost = pl.CostEstimate(
        flops=8 * N * C * S,
        transcendentals=N * C * S + N * S,
        bytes_accessed=int(x.size) * x_item + int(t.size) * t_item
        + grid_n * 2 * _SUB * _LANE * 4,
    )

    parts = pl.pallas_call(
        kernel,
        out_shape=jax.ShapeDtypeStruct((grid_n, 2, _SUB, _LANE), jnp.float32),
        grid=(grid_n, grid_s),
        in_specs=[
            pl.BlockSpec((bn, C, tile_s), lambda n, s: (n, 0, s)),
            pl.BlockSpec((bn, C, tile_s), lambda n, s: (n, 0, s)),
        ],
        out_specs=pl.BlockSpec((1, 2, _SUB, _LANE), lambda n, s: (n, 0, 0, 0)),
        scratch_shapes=[pltpu.SMEM((2,), jnp.float32)],
        compiler_params=pltpu.CompilerParams(
            # Batch-block axis writes disjoint partial outputs -> truly parallel
            # (lets v7x shard it across both TensorCores); the spatial axis is
            # the in-block reduction.
            dimension_semantics=("parallel", "arbitrary"),
            vmem_limit_bytes=vmem_limit,
        ),
        cost_estimate=cost,
    )(x, t)

    intersection = jnp.sum(parts[:, 0, 0, 0])
    t_sum = jnp.sum(parts[:, 1, 0, 0])
    # sum(softmax(x)) over every element == number of spatial positions (rows
    # of the softmax sum to 1), so it never needs to be computed.
    p_sum = jnp.float32(N * S)
    dice = (2.0 * intersection + smooth) / (p_sum + t_sum + smooth)
    return 1.0 - dice


def dice_loss_ref(inputs, targets, smooth=1):
    p = jax.nn.softmax(inputs.astype(jnp.float32), axis=1).reshape(-1)
    t = targets.astype(jnp.float32).reshape(-1)
    intersection = jnp.sum(p * t)
    dice = (2.0 * intersection + smooth) / (jnp.sum(p) + jnp.sum(t) + smooth)
    return 1.0 - dice


if __name__ == "__main__":
    key = jax.random.PRNGKey(0)
    k1, k2, k3, k4 = jax.random.split(key, 4)

    # Case 1: lane-aligned spatial size (S = 256), f32 logits / f32 targets.
    N, C, H, W = 2, 4, 16, 16
    x1 = jax.random.normal(k1, (N, C, H, W), dtype=jnp.float32)
    t1 = jax.random.bernoulli(k2, 0.3, (N, C, H, W)).astype(jnp.float32)
    out1 = jax.block_until_ready(dice_loss(x1, t1))
    ref1 = dice_loss_ref(x1, t1)
    assert jnp.allclose(out1, ref1, atol=2e-3, rtol=2e-3), (out1, ref1)

    # Case 2: ragged spatial size (S = 150) + bf16 logits — exercises the
    # in-kernel tail masking and the narrow-dtype input path (no jnp.pad).
    x2 = jax.random.normal(k3, (2, 3, 15, 10), dtype=jnp.bfloat16)
    t2 = jax.random.bernoulli(k4, 0.4, (2, 3, 15, 10)).astype(jnp.float32)
    out2 = jax.block_until_ready(dice_loss(x2, t2))
    ref2 = dice_loss_ref(x2, t2)
    assert jnp.allclose(out2, ref2, atol=2e-3, rtol=2e-3), (out2, ref2)

    # Case 3: tiny forced block budget -> multi-step spatial grid with a ragged
    # last tile; checks cross-step accumulation under ("parallel","arbitrary").
    x3 = jax.random.normal(k1, (4, 4, 24, 24), dtype=jnp.float32)
    t3 = jax.random.bernoulli(k2, 0.2, (4, 4, 24, 24)).astype(jnp.float32)
    out3 = jax.block_until_ready(dice_loss(x3, t3, block_budget_bytes=24 * 1024))
    ref3 = dice_loss_ref(x3, t3)
    assert jnp.allclose(out3, ref3, atol=2e-3, rtol=2e-3), (out3, ref3)

    print("KERNEL_OK")
</pallas_src>

<mosaic_0001>
module attributes {stable_mosaic.version = 11 : i64} {
  func.func @_dice_loss_kernel(%arg0: i32, %arg1: i32, %arg2: memref<2x4x256xf32, #tpu.memory_space<vmem>>, %arg3: memref<2x4x256xf32, #tpu.memory_space<vmem>>, %arg4: memref<1x2x8x128xf32, #tpu.memory_space<vmem>>, %arg5: memref<2xf32, #tpu.memory_space<smem>>) attributes {dimension_semantics = [#tpu.dimension_semantics<parallel>, #tpu.dimension_semantics<arbitrary>], iteration_bounds = array<i64: 1, 1>, scalar_prefetch = 0 : i64, scratch_operands = 1 : i64, tpu.core_type = #tpu.core_type<tc>, window_params = [{transform_indices = @transform_0, window_bounds = array<i64: 2, 4, 256>}, {transform_indices = @transform_1, window_bounds = array<i64: 2, 4, 256>}, {transform_indices = @transform_2, window_bounds = array<i64: 1, 2, 8, 128>}]} {
    %c0_i32 = arith.constant 0 : i32
    %0 = arith.cmpi eq, %arg1, %c0_i32 : i32
    %1 = arith.extui %0 : i1 to i32
    %c0_i32_0 = arith.constant 0 : i32
    %2 = arith.cmpi ne, %1, %c0_i32_0 : i32
    scf.if %2 {
      %cst_15 = arith.constant 0.000000e+00 : f32
      %c0_16 = arith.constant 0 : index
      %34 = memref.load %arg5[%c0_16] : memref<2xf32, #tpu.memory_space<smem>>
      memref.store %cst_15, %arg5[%c0_16] : memref<2xf32, #tpu.memory_space<smem>>
      %cst_17 = arith.constant 0.000000e+00 : f32
      %c1_18 = arith.constant 1 : index
      %35 = memref.load %arg5[%c1_18] : memref<2xf32, #tpu.memory_space<smem>>
      memref.store %cst_17, %arg5[%c1_18] : memref<2xf32, #tpu.memory_space<smem>>
    } else {
    }
    %c0 = arith.constant 0 : index
    %c0_1 = arith.constant 0 : index
    %c0_2 = arith.constant 0 : index
    %3 = vector.load %arg2[%c0, %c0_1, %c0_2] : memref<2x4x256xf32, #tpu.memory_space<vmem>>, vector<2x4x256xf32>
    %c0_3 = arith.constant 0 : index
    %c0_4 = arith.constant 0 : index
    %c0_5 = arith.constant 0 : index
    %4 = vector.load %arg3[%c0_3, %c0_4, %c0_5] : memref<2x4x256xf32, #tpu.memory_space<vmem>>, vector<2x4x256xf32>
    %cst = arith.constant dense<0xFF800000> : vector<2x256xf32>
    %5 = vector.multi_reduction <maximumf>, %3, %cst [1] : vector<2x4x256xf32> to vector<2x256xf32>
    %6 = vector.shape_cast %5 : vector<2x256xf32> to vector<2x1x256xf32>
    %7 = vector.broadcast %6 : vector<2x1x256xf32> to vector<2x4x256xf32>
    %8 = arith.subf %3, %7 : vector<2x4x256xf32>
    %9 = math.exp %8 : vector<2x4x256xf32>
    %cst_6 = arith.constant dense<0.000000e+00> : vector<2x256xf32>
    %10 = vector.multi_reduction <add>, %9, %cst_6 [1] : vector<2x4x256xf32> to vector<2x256xf32>
    %11 = vector.shape_cast %10 : vector<2x256xf32> to vector<2x1x256xf32>
    %12 = arith.mulf %9, %4 : vector<2x4x256xf32>
    %cst_7 = arith.constant dense<0.000000e+00> : vector<2x256xf32>
    %13 = vector.multi_reduction <add>, %12, %cst_7 [1] : vector<2x4x256xf32> to vector<2x256xf32>
    %14 = vector.shape_cast %13 : vector<2x256xf32> to vector<2x1x256xf32>
    %15 = tpu.reciprocal %11 {approx = true} : vector<2x1x256xf32> -> vector<2x1x256xf32>
    %16 = arith.mulf %14, %15 : vector<2x1x256xf32>
    %c0_8 = arith.constant 0 : index
    %17 = memref.load %arg5[%c0_8] : memref<2xf32, #tpu.memory_space<smem>>
    %18 = vector.shape_cast %16 : vector<2x1x256xf32> to vector<1x2x1x256xf32>
    %cst_9 = arith.constant dense<0.000000e+00> : vector<1xf32>
    %19 = vector.multi_reduction <add>, %18, %cst_9 [1, 2, 3] : vector<1x2x1x256xf32> to vector<1xf32>
    %20 = vector.shape_cast %19 : vector<1xf32> to vector<1x1x1x1xf32>
    %21 = vector.extract %20[0, 0, 0, 0] : f32 from vector<1x1x1x1xf32>
    %22 = arith.addf %17, %21 : f32
    %c0_10 = arith.constant 0 : index
    %23 = memref.load %arg5[%c0_10] : memref<2xf32, #tpu.memory_space<smem>>
    memref.store %22, %arg5[%c0_10] : memref<2xf32, #tpu.memory_space<smem>>
    %c1 = arith.constant 1 : index
    %24 = memref.load %arg5[%c1] : memref<2xf32, #tpu.memory_space<smem>>
    %25 = vector.shape_cast %4 : vector<2x4x256xf32> to vector<1x2x4x256xf32>
    %cst_11 = arith.constant dense<0.000000e+00> : vector<1xf32>
    %26 = vector.multi_reduction <add>, %25, %cst_11 [1, 2, 3] : vector<1x2x4x256xf32> to vector<1xf32>
    %27 = vector.shape_cast %26 : vector<1xf32> to vector<1x1x1x1xf32>
    %28 = vector.extract %27[0, 0, 0, 0] : f32 from vector<1x1x1x1xf32>
    %29 = arith.addf %24, %28 : f32
    %c1_12 = arith.constant 1 : index
    %30 = memref.load %arg5[%c1_12] : memref<2xf32, #tpu.memory_space<smem>>
    memref.store %29, %arg5[%c1_12] : memref<2xf32, #tpu.memory_space<smem>>
    %c0_i32_13 = arith.constant 0 : i32
    %31 = arith.cmpi eq, %arg1, %c0_i32_13 : i32
    %32 = arith.extui %31 : i1 to i32
    %c0_i32_14 = arith.constant 0 : i32
    %33 = arith.cmpi ne, %32, %c0_i32_14 : i32
    scf.if %33 {
      %c0_15 = arith.constant 0 : index
      %34 = memref.load %arg5[%c0_15] : memref<2xf32, #tpu.memory_space<smem>>
      %35 = vector.broadcast %34 : f32 to vector<8x128xf32>
      %c0_16 = arith.constant 0 : index
      %c0_17 = arith.constant 0 : index
      %c0_18 = arith.constant 0 : index
      %c0_19 = arith.constant 0 : index
      %36 = vector.load %arg4[%c0_16, %c0_17, %c0_18, %c0_19] : memref<1x2x8x128xf32, #tpu.memory_space<vmem>>, vector<1x1x8x128xf32>
      %37 = vector.shape_cast %36 : vector<1x1x8x128xf32> to vector<8x128xf32>
      %38 = vector.shape_cast %35 : vector<8x128xf32> to vector<1x1x8x128xf32>
      tpu.vector_store %arg4[%c0_16, %c0_17, %c0_18, %c0_19], %38 {strides = array<i32>} : memref<1x2x8x128xf32, #tpu.memory_space<vmem>>, vector<1x1x8x128xf32>,
      %c1_20 = arith.constant 1 : index
      %39 = memref.load %arg5[%c1_20] : memref<2xf32, #tpu.memory_space<smem>>
      %40 = vector.broadcast %39 : f32 to vector<8x128xf32>
      %c0_21 = arith.constant 0 : index
      %c1_22 = arith.constant 1 : index
      %c0_23 = arith.constant 0 : index
      %c0_24 = arith.constant 0 : index
      %41 = vector.load %arg4[%c0_21, %c1_22, %c0_23, %c0_24] : memref<1x2x8x128xf32, #tpu.memory_space<vmem>>, vector<1x1x8x128xf32>
      %42 = vector.shape_cast %41 : vector<1x1x8x128xf32> to vector<8x128xf32>
      %43 = vector.shape_cast %40 : vector<8x128xf32> to vector<1x1x8x128xf32>
      tpu.vector_store %arg4[%c0_21, %c1_22, %c0_23, %c0_24], %43 {strides = array<i32>} : memref<1x2x8x128xf32, #tpu.memory_space<vmem>>, vector<1x1x8x128xf32>,
    } else {
    }
    return
  }
  func.func @transform_0(%arg0: i32, %arg1: i32) -> (i32, i32, i32) {
    %c0_i32 = arith.constant 0 : i32
    %c0_i32_0 = arith.constant 0 : i32
    return %arg0, %c0_i32, %arg1 : i32, i32, i32
  }
  func.func @transform_1(%arg0: i32, %arg1: i32) -> (i32, i32, i32) {
    %c0_i32 = arith.constant 0 : i32
    %c0_i32_0 = arith.constant 0 : i32
    return %arg0, %c0_i32, %arg1 : i32, i32, i32
  }
  func.func @transform_2(%arg0: i32, %arg1: i32) -> (i32, i32, i32, i32) {
    %c0_i32 = arith.constant 0 : i32
    %c0_i32_0 = arith.constant 0 : i32
    %c0_i32_1 = arith.constant 0 : i32
    %c0_i32_2 = arith.constant 0 : i32
    return %arg0, %c0_i32, %c0_i32_0, %c0_i32_1 : i32, i32, i32, i32
  }
}

</mosaic_0001>

<bundles_post_ra>
// kernel: tpu_custom_call.1
= control target key start
LH: loop header
LB: loop body
LE: loop exit
PB: predicated region body
PF: predicated region fallthrough
CT: control target
= control target key end

     0   :  { %7 = vsyncpa [#allocation4], 0  ;;  %s417_s0 = inlined_call_operand.hbm [shape: f32[2,4,256], index: 0, kind: input, shape index: {}]   ;;  %s418_s1 = inlined_call_operand.hbm [shape: f32[2,4,256], index: 1, kind: input, shape index: {}]   ;;  %s419_s2 = inlined_call_operand.hbm [shape: f32[1,2,8,128], index: 2, kind: output, shape index: {}]  }
   0x1   :  { %8 = vsyncpa [#allocation7], 0 }
   0x2   :  { %9 = vsyncpa [#allocation5], 0  ;;  %s347_s9 = smov [#allocation3]  }
   0x3   :  { %s15_s10 = sshll.u32 %s347_s9, 4  ;;  %s16_s10 = int_to_ptr.vmem [resolvable:$true] %s15_s10 }
   0x4   :  { %s289_s11 = scalar_lea.vmem %s16_s10, 256  ;;  %p294_p1 = scmp.lt.s32.totalorder %s16_s10, %s16_s10 }
   0x5   :  { %p290_p0 = scmp.ne.s32.totalorder %s16_s10, %s289_s11  ;;  %p295_p2 = scmp.lt.s32.totalorder %s289_s11, %s289_s11 }
   0x7   :  { %p296_p3 = por %p295_p2, %p294_p1 }
   0x9   :  { %p297_p4 = pnand %p296_p3, %p290_p0 }
   0xb   :  { %300 = shalt.err (!%p297_p4)
}
   0xc   :  { %s348_s12 = smov 128   ;;  %s349_s13 = smov 8  }
   0xd   :  { %21 = dma.hbm_to_vmem [thread:$0]  %s417_s0, 256, %s16_s10, [#allocation4], %s348_s12, %s348_s12, %s349_s13  }
   0xe   :  { %s350_s16 = smov [#allocation6]  }
   0xf   :  { %s27_s17 = sshll.u32 %s350_s16, 4  ;;  %s28_s17 = int_to_ptr.vmem [resolvable:$true] %s27_s17 }
  0x10   :  { %s309_s18 = scalar_lea.vmem %s28_s17, 256  ;;  %p314_p6 = scmp.lt.s32.totalorder %s28_s17, %s28_s17 }
  0x11   :  { %p310_p5 = scmp.ne.s32.totalorder %s28_s17, %s309_s18  ;;  %p315_p7 = scmp.lt.s32.totalorder %s309_s18, %s309_s18 }
  0x13   :  { %p316_p8 = por %p315_p7, %p314_p6 }
  0x15   :  { %p317_p9 = pnand %p316_p8, %p310_p5 }
  0x17   :  { %320 = shalt.err (!%p317_p9)
}
  0x18   :  { %33 = dma.hbm_to_vmem [thread:$0]  %s418_s1, 256, %s28_s17, [#allocation7], %s348_s12, %s348_s12, %s349_s13  }
  0x19   :  { %341 = dma.done.wait [#allocation4], 256  }
  0x1a   :  { %342 = vsyncadd [#allocation4], 4294967040 }
  0x1b   :  { %343 = dma.done.wait [#allocation7], 256  }
  0x1c   :  { %344 = vsyncadd [#allocation7], 4294967040  ;;  %vm58_vm0 = vcmask 1043456   ;;  %v48_v0 = vld [vmem:[#allocation3] sm:$0xff]  ;;  %v49_v1 = vld [vmem:[#allocation3 + $0x8] sm:$0xff]  ;;  %vm180_vm1 = vcmask 1040384  }
  0x1d   :  { %v54_v2 = vcombine.high %v48_v0, %v48_v0  ;;  %v55_v3 = vcombine.high %v49_v1, %v49_v1  ;;  %v59_v4 = vsel %vm58_vm0, %v48_v0, -inf  ;;  %v73_v5 = vsel %vm58_vm0, %v49_v1, -inf  ;;  %v383_v38 = vld [vmem:[#allocation6] sm:$0xff]  ;;  %v385_v39 = vld [vmem:[#allocation6 + $0x8] sm:$0xff]  ;;  %s351_s1 = smov [#allocation8]  }
  0x1e   :  { %v60_v6 = vrot.slane %v59_v4, 4  ;;  %v74_v7 = vrot.slane %v73_v5, 4  ;;  %s241_s21 = sshll.u32 %s351_s1, 4  ;;  %s242_s21 = int_to_ptr.vmem [resolvable:$true] %s241_s21 }
  0x1f   :  { %v66_v8 = vsel %vm58_vm0, %v54_v2, -inf  ;;  %v80_v9 = vsel %vm58_vm0, %v55_v3, -inf  ;;  %s321_s23 = scalar_lea.vmem %s242_s21, 256  ;;  %p326_p11 = scmp.lt.s32.totalorder %s242_s21, %s242_s21 }
  0x20   :  { %v61_v10 = vmax.f32 %v59_v4, %v60_v6  ;;  %v67_v11 = vrot.slane %v66_v8, 4  ;;  %v75_v12 = vmax.f32 %v73_v5, %v74_v7  ;;  %v81_v13 = vrot.slane %v80_v9, 4  ;;  %p322_p10 = scmp.ne.s32.totalorder %s242_s21, %s321_s23  ;;  %p327_p12 = scmp.lt.s32.totalorder %s321_s23, %s321_s23 }
  0x22   :  { %v62_v14 = vrot.slane %v61_v10, 2  ;;  %v68_v15 = vmax.f32 %v66_v8, %v67_v11  ;;  %v76_v16 = vrot.slane %v75_v12, 2  ;;  %v82_v17 = vmax.f32 %v80_v9, %v81_v13  ;;  %p328_p13 = por %p327_p12, %p326_p11 }
  0x24   :  { %v63_v18 = vmax.f32 %v61_v10, %v62_v14  ;;  %v69_v19 = vrot.slane %v68_v15, 2  ;;  %v77_v20 = vmax.f32 %v75_v12, %v76_v16  ;;  %v83_v21 = vrot.slane %v82_v17, 2  ;;  %p329_p0 = pnand %p328_p13, %p322_p10 }
  0x26   :  { %v64_v22 = vrot.slane %v63_v18, 1  ;;  %v70_v23 = vmax.f32 %v68_v15, %v69_v19  ;;  %v78_v24 = vrot.slane %v77_v20, 1  ;;  %v84_v25 = vmax.f32 %v82_v17, %v83_v21 }
  0x28   :  { %v65_v26 = vmax.f32 %v63_v18, %v64_v22  ;;  %v71_v27 = vrot.slane %v70_v23, 1  ;;  %v79_v28 = vmax.f32 %v77_v20, %v78_v24  ;;  %v85_v29 = vrot.slane %v84_v25, 1 }
  0x2a   :  { %v72_v30 = vmax.f32 %v70_v23, %v71_v27  ;;  %v86_v31 = vmax.f32 %v84_v25, %v85_v29 }
  0x2c   :  { %v91_v32 = vcombine.low %v65_v26, %v72_v30  ;;  %v92_v33 = vcombine.low %v79_v28, %v86_v31 }
  0x2e   :  { %v95_v34 = vsub.f32 %v48_v0, %v91_v32  ;;  %v96_v35 = vsub.f32 %v49_v1, %v92_v33 }
  0x30   :  { %v97_v36 = vmul.f32 1.442695, %v95_v34  ;;  %v99_v37 = vmul.f32 1.442695, %v96_v35 }
  0x32   :  { %269 = vpow2.f32 %v97_v36 }
  0x33   :  { %271 = vpow2.f32 %v99_v37  ;;  %v203_v37 = vcombine.high %v383_v38, %v383_v38 }
  0x3f   :  { %v270_v40 = vpop.eup %269 }
  0x40   :  { %v272_v41 = vpop.eup %271  ;;  %v103_v42 = vcombine.high %v270_v40, %v270_v40  ;;  %v107_v43 = vsel %vm58_vm0, %v270_v40, 0.0  ;;  %v135_v44 = vmul.f32 %v270_v40, %v383_v38 }
  0x41   :  { %v104_v45 = vcombine.high %v272_v41, %v272_v41  ;;  %v108_v46 = vrot.slane %v107_v43, 4  ;;  %v121_v47 = vsel %vm58_vm0, %v272_v41, 0.0  ;;  %v136_v48 = vmul.f32 %v272_v41, %v385_v39 }
  0x42   :  { %v114_v49 = vsel %vm58_vm0, %v103_v42, 0.0  ;;  %v122_v50 = vrot.slane %v121_v47, 4  ;;  %v139_v51 = vcombine.high %v135_v44, %v135_v44  ;;  %v143_v52 = vsel %vm58_vm0, %v135_v44, 0.0 }
  0x43   :  { %v109_v53 = vadd.f32 %v108_v46, %v107_v43  ;;  %v115_v54 = vrot.slane %v114_v49, 4  ;;  %v128_v55 = vsel %vm58_vm0, %v104_v45, 0.0  ;;  %v140_v56 = vcombine.high %v136_v48, %v136_v48 }
  0x44   :  { %v123_v57 = vadd.f32 %v122_v50, %v121_v47  ;;  %v129_v58 = vrot.slane %v128_v55, 4  ;;  %v144_v59 = vrot.slane %v143_v52, 4  ;;  %v150_v60 = vsel %vm58_vm0, %v139_v51, 0.0 }
  0x45   :  { %v110_v61 = vrot.slane %v109_v53, 2  ;;  %v116_v62 = vadd.f32 %v115_v54, %v114_v49  ;;  %v151_v63 = vrot.slane %v150_v60, 4  ;;  %v157_v0 = vsel %vm58_vm0, %v136_v48, 0.0 }
  0x46   :  { %v124_v1 = vrot.slane %v123_v57, 2  ;;  %v130_v2 = vadd.f32 %v129_v58, %v128_v55  ;;  %v158_v3 = vrot.slane %v157_v0, 4  ;;  %v145_v6 = vadd.f32 %v144_v59, %v143_v52 }
  0x47   :  { %v111_v4 = vadd.f32 %v110_v61, %v109_v53  ;;  %v117_v5 = vrot.slane %v116_v62, 2  ;;  %v164_v7 = vsel %vm58_vm0, %v140_v56, 0.0  ;;  %v152_v13 = vadd.f32 %v151_v63, %v150_v60 }
  0x48   :  { %v125_v8 = vadd.f32 %v124_v1, %v123_v57  ;;  %v131_v9 = vrot.slane %v130_v2, 2  ;;  %v159_v10 = vadd.f32 %v158_v3, %v157_v0  ;;  %v165_v14 = vrot.slane %v164_v7, 4 }
  0x49   :  { %v112_v11 = vrot.slane %v111_v4, 1  ;;  %v118_v12 = vadd.f32 %v117_v5, %v116_v62  ;;  %v146_v19 = vrot.slane %v145_v6, 2  ;;  %v153_v25 = vrot.slane %v152_v13, 2 }
  0x4a   :  { %v126_v15 = vrot.slane %v125_v8, 1  ;;  %v132_v16 = vadd.f32 %v131_v9, %v130_v2  ;;  %v166_v20 = vadd.f32 %v165_v14, %v164_v7  ;;  %v160_v23 = vrot.slane %v159_v10, 2 }
  0x4b   :  { %v113_v17 = vadd.f32 %v112_v11, %v111_v4  ;;  %v119_v18 = vrot.slane %v118_v12, 1  ;;  %v147_v28 = vadd.f32 %v146_v19, %v145_v6  ;;  %v154_v30 = vadd.f32 %v153_v25, %v152_v13 }
  0x4c   :  { %v127_v21 = vadd.f32 %v126_v15, %v125_v8  ;;  %v133_v22 = vrot.slane %v132_v16, 1  ;;  %v167_v27 = vrot.slane %v166_v20, 2  ;;  %v161_v29 = vadd.f32 %v160_v23, %v159_v10 }
  0x4d   :  { %v120_v24 = vadd.f32 %v119_v18, %v118_v12  ;;  %273 = vrcp.f32 %v113_v17  ;;  %v148_v32 = vrot.slane %v147_v28, 1  ;;  %v155_v34 = vrot.slane %v154_v30, 1 }
  0x4e   :  { %v134_v26 = vadd.f32 %v133_v22, %v132_v16  ;;  %275 = vrcp.f32 %v127_v21  ;;  %v168_v31 = vadd.f32 %v167_v27, %v166_v20  ;;  %v162_v33 = vrot.slane %v161_v29, 1 }
  0x4f   :  { %277 = vrcp.f32 %v120_v24  ;;  %v149_v36 = vadd.f32 %v148_v32, %v147_v28  ;;  %v156_v41 = vadd.f32 %v155_v34, %v154_v30  ;;  %v207_v46 = vsel %vm58_vm0, %v383_v38, 0.0 }
  0x50   :  { %279 = vrcp.f32 %v134_v26  ;;  %v169_v35 = vrot.slane %v168_v31, 1  ;;  %v163_v40 = vadd.f32 %v162_v33, %v161_v29  ;;  %v208_v47 = vsel %vm58_vm0, %v203_v37, 0.0 }
  0x51   :  { %v209_v54 = vadd.f32 %v208_v47, %v207_v46  ;;  %v204_v57 = vcombine.high %v385_v39, %v385_v39  ;;  %v210_v38 = vsel %vm58_vm0, %v385_v39, 0.0 }
  0x52   :  { %v170_v43 = vadd.f32 %v169_v35, %v168_v31 }
  0x53   :  { %v211_v61 = vadd.f32 %v210_v38, %v209_v54  ;;  %v212_v62 = vsel %vm58_vm0, %v204_v57, 0.0 }
  0x55   :  { %v213_v0 = vadd.f32 %v212_v62, %v211_v61 }
  0x5a   :  { %v274_v42 = vpop.eup %273 }
  0x5b   :  { %v276_v44 = vpop.eup %275  ;;  %v175_v45 = vmul.f32 %v274_v42, %v149_v36 }
  0x5c   :  { %v278_v48 = vpop.eup %277  ;;  %v177_v49 = vmul.f32 %v276_v44, %v163_v40 }
  0x5d   :  { %v280_v50 = vpop.eup %279  ;;  %v176_v51 = vmul.f32 %v278_v48, %v156_v41  ;;  %v181_v52 = vsel %vm180_vm1, %v175_v45, 0.0 }
  0x5e   :  { %v178_v53 = vmul.f32 %v280_v50, %v170_v43  ;;  %v184_v56 = vsel %vm180_vm1, %v177_v49, 0.0 }
  0x5f   :  { %v182_v55 = vsel %vm180_vm1, %v176_v51, 0.0 }
  0x60   :  { %v183_v58 = vadd.f32 %v182_v55, %v181_v52  ;;  %v186_v59 = vsel %vm180_vm1, %v178_v53, 0.0 }
  0x62   :  { %v185_v60 = vadd.f32 %v184_v56, %v183_v58 }
  0x64   :  { %v187_v63 = vadd.f32 %v186_v59, %v185_v60 }
  0x66   :  { %188 = vadd.xlane.f32.xlu0 %v187_v63 }
  0x6a   :  { %214 = vadd.xlane.f32.xlu0 %v213_v0 }
  0xef   :  { %v189_v1 = vpop.xlane.xlu0 %188 }
  0xf0   :  { %v190_v2 = vrot.slane %v189_v1, 4 }
  0xf2   :  { %v191_v3 = vadd.f32 %v190_v2, %v189_v1 }
  0xf3   :  { %v215_v4 = vpop.xlane.xlu0 %214 }
  0xf4   :  { %v192_v5 = vrot.slane %v191_v3, 2  ;;  %v216_v6 = vrot.slane %v215_v4, 4 }
  0xf6   :  { %v217_v7 = vadd.f32 %v216_v6, %v215_v4  ;;  %v193_v8 = vadd.f32 %v192_v5, %v191_v3 }
  0xf8   :  { %v218_v39 = vrot.slane %v217_v7, 2  ;;  %v194_v9 = vrot.slane %v193_v8, 1 }
  0xfa   :  { %v219_v10 = vadd.f32 %v218_v39, %v217_v7  ;;  %v195_v11 = vadd.f32 %v194_v9, %v193_v8 }
  0xfc   :  { %256 = vpush %v195_v11  ;;  %v220_v12 = vrot.slane %v219_v10, 1 }
  0xfe   :  { %v221_v13 = vadd.f32 %v220_v12, %v219_v10 }
 0x100   :  { %258 = vpush %v221_v13 }
 0x12d   :  { %s257_s0 = spop %256 }
 0x12e   :  { %v230_v14 = vstv %s257_s0 }
 0x12f   :  { %231 = vst [vmem:[#allocation8] sm:$0xff] %v230_v14 }
 0x131   :  { %s259_s22 = spop %258 }
 0x132   :  { %v233_v15 = vstv %s259_s22 }
 0x133   :  { %235 = vst [vmem:[#allocation8 + $0x8] sm:$0xff] %v233_v15 }
 0x134   :  { %332 = shalt.err (!%p329_p0)
}
 0x135   :  { %247 = dma.vmem_to_hbm [thread:$0]  %s242_s21, 256, %s419_s2, [#allocation5], %s348_s12, %s348_s12, %s349_s13  }
 0x136   :  { %345 = dma.done.wait [#allocation5], 256  }
 0x137   :  { %346 = vsyncadd [#allocation5], 4294967040 }
 0x138   :  { %251 = vsyncpa [#allocation4], 1 }
 0x139   :  { %252 = vsyncpa [#allocation7], 1 }
 0x13a   :  { %253 = vsyncpa [#allocation5], 1 }

</bundles_post_ra>
